<compile_context>
chip_gen: v6e
topology: v6e:2x2x1
jax: 0.10.0
libtpu: 0.0.40
codegen_flags: <defaults>
</compile_context>

<pallas_src>
import jax
import jax.numpy as jnp
from jax.experimental import pallas as pl
from jax.experimental.pallas import tpu as pltpu


def mlp_kernel(x_ref, w1_ref, b1_ref, w2_ref, b2_ref, w3_ref, b3_ref,
               w4_ref, o_ref):
    # x_ref: (1, TM) node features, nodes on lanes.
    x = x_ref[...]                                                 # (1, TM) f32

    # Layer 1: Linear(1, 64) as a broadcasted outer product on the VPU
    # (contraction dim is 1 — no reason to touch the MXU), kept in f32.
    h = jnp.maximum(w1_ref[...] * x + b1_ref[...], 0.0)           # (64, TM) f32

    # Layer 2: Linear(64, 64) + ReLU.  W2^T @ H on the MXU, bf16 inputs,
    # f32 accumulation; bias/ReLU in f32 on the VPU.
    h = jnp.dot(w2_ref[...], h.astype(w2_ref.dtype),
                preferred_element_type=jnp.float32) + b2_ref[...]
    h = jnp.maximum(h, 0.0)                                        # (64, TM) f32

    # Layer 3: Linear(64, 64) + ReLU.
    h = jnp.dot(w3_ref[...], h.astype(w3_ref.dtype),
                preferred_element_type=jnp.float32) + b3_ref[...]
    h = jnp.maximum(h, 0.0)                                        # (64, TM) f32

    # Head: Linear(64, 1) as (1,64)@(64,TM) -> lane-dense (1, TM) output.
    # The scalar bias b4 is added in the wrapper.
    o_ref[...] = jnp.dot(w4_ref[...], h.astype(w4_ref.dtype),
                         preferred_element_type=jnp.float32).astype(o_ref.dtype)


def mlp_net(x, params, *, tm=512, mxu_dtype=jnp.bfloat16):
    """Run the fused MLP kernel over N nodes.

    x: (N, 1) f32 node features.  Weights stored as (in, out); biases (1, out).
    tm: lane-tile size (multiple of 128).  Keep grid >= 2 steps so both
        TensorCores get work on v7x.
    """
    N, F = x.shape
    assert F == 1
    w1, b1, w2, b2, w3, b3, w4, b4 = params

    # Pad N up to a multiple of tm, then transpose so nodes sit on lanes.
    n_pad = (-N) % tm
    Np = N + n_pad
    xT = jnp.pad(x, ((0, n_pad), (0, 0))).T                        # (1, Np)

    # Transposed parameter layout.
    w1c = w1.T.astype(jnp.float32)                                 # (64, 1)
    b1c = b1.reshape(64, 1).astype(jnp.float32)                    # (64, 1)
    w2t = w2.T.astype(mxu_dtype)                                   # (64, 64)
    b2c = b2.reshape(64, 1).astype(jnp.float32)                    # (64, 1)
    w3t = w3.T.astype(mxu_dtype)                                   # (64, 64)
    b3c = b3.reshape(64, 1).astype(jnp.float32)                    # (64, 1)
    w4t = w4.T.astype(mxu_dtype)                                   # (1, 64)

    def const_spec(shape):
        # Whole (small) parameter resident in VMEM; constant block index so it
        # is not re-fetched per grid step.
        return pl.BlockSpec(shape, lambda i: (0, 0))

    outT = pl.pallas_call(
        mlp_kernel,
        out_shape=jax.ShapeDtypeStruct((1, Np), jnp.float32),
        grid_spec=pltpu.PrefetchScalarGridSpec(
            num_scalar_prefetch=0,
            grid=(Np // tm,),
            in_specs=[
                pl.BlockSpec((1, tm), lambda i: (0, i)),   # x tile (lane-dense)
                const_spec((64, 1)),                       # w1 (column)
                const_spec((64, 1)),                       # b1
                const_spec((64, 64)),                      # w2^T
                const_spec((64, 1)),                       # b2
                const_spec((64, 64)),                      # w3^T
                const_spec((64, 1)),                       # b3
                const_spec((1, 64)),                       # w4^T
            ],
            out_specs=pl.BlockSpec((1, tm), lambda i: (0, i)),
        ),
        compiler_params=pltpu.CompilerParams(
            dimension_semantics=("parallel",),
            vmem_limit_bytes=32 * 1024 * 1024,
        ),
    )(xT, w1c, b1c, w2t, b2c, w3t, b3c, w4t)

    # Back to (N, 1) and fold in the scalar head bias.
    return outT.T[:N] + b4.reshape(1, 1)


def init_params(key):
    """Deterministic init mimicking torch.nn.Linear default U[-1/sqrt(fan_in), ..]."""
    def linear(key, fan_in, fan_out):
        kw, kb = jax.random.split(key)
        bound = 1.0 / jnp.sqrt(jnp.float32(fan_in))
        w = jax.random.uniform(kw, (fan_in, fan_out), jnp.float32, -bound, bound)
        b = jax.random.uniform(kb, (1, fan_out), jnp.float32, -bound, bound)
        return w, b

    k1, k2, k3, k4 = jax.random.split(key, 4)
    w1, b1 = linear(k1, 1, 64)
    w2, b2 = linear(k2, 64, 64)
    w3, b3 = linear(k3, 64, 64)
    w4, b4 = linear(k4, 64, 1)
    return (w1, b1, w2, b2, w3, b3, w4, b4)


def mlp_ref_matched(x, params, mxu_dtype=jnp.bfloat16):
    """Pure-JAX reference matching the kernel's mixed precision: matmul
    operands rounded to bf16, exact (highest-precision) products, f32
    accumulate/elementwise."""
    w1, b1, w2, b2, w3, b3, w4, b4 = params
    q = lambda a: a.astype(mxu_dtype).astype(jnp.float32)
    hi = jax.lax.Precision.HIGHEST
    h = jnp.maximum(x * w1 + b1, 0.0)            # layer 1: exact f32 broadcast
    h = jnp.maximum(jnp.dot(q(h), q(w2), precision=hi) + b2, 0.0)
    h = jnp.maximum(jnp.dot(q(h), q(w3), precision=hi) + b3, 0.0)
    return jnp.dot(q(h), q(w4), precision=hi) + b4


def mlp_ref_f32(x, params):
    """True full-f32 forward pass (module semantics, no quantization)."""
    w1, b1, w2, b2, w3, b3, w4, b4 = params
    hi = jax.lax.Precision.HIGHEST
    h = jnp.maximum(x @ w1 + b1, 0.0)
    h = jnp.maximum(jnp.dot(h, w2, precision=hi) + b2, 0.0)
    h = jnp.maximum(jnp.dot(h, w3, precision=hi) + b3, 0.0)
    return jnp.dot(h, w4, precision=hi) + b4


if __name__ == "__main__":
    key = jax.random.PRNGKey(0)
    kx, kp = jax.random.split(key)

    # Synthetic graph: 2048 nodes, 1 feature each (edge_index is unused by the
    # module's forward, so none is constructed).  tm=512 -> 4 grid steps, so
    # both v7x TensorCores get work on the "parallel" axis.
    N = 2048
    x = jax.random.normal(kx, (N, 1), jnp.float32)
    params = init_params(kp)

    out = jax.block_until_ready(mlp_net(x, params, tm=512))
    assert out.shape == (N, 1)

    # (1) Tight check against the precision-matched reference (bf16 matmul
    #     operands, f32 accumulate).  Previously observed max err ~1.9e-4.
    ref_m = mlp_ref_matched(x, params)
    err_m = float(jnp.max(jnp.abs(out - ref_m)))
    assert jnp.allclose(out, ref_m, atol=2e-3, rtol=2e-3), err_m

    # (2) Loose sanity check against the exact f32 forward pass (module
    #     semantics); bounds the total bf16 quantization error.
    ref_f = mlp_ref_f32(x, params)
    err_f = float(jnp.max(jnp.abs(out - ref_f)))
    assert jnp.allclose(out, ref_f, atol=5e-2, rtol=5e-2), err_f

    print("KERNEL_OK")
</pallas_src>

<mosaic_0001>
module attributes {stable_mosaic.version = 11 : i64} {
  func.func @mlp_kernel(%arg0: i32, %arg1: memref<1x512xf32, #tpu.memory_space<vmem>>, %arg2: memref<64x1xf32, #tpu.memory_space<vmem>>, %arg3: memref<64x1xf32, #tpu.memory_space<vmem>>, %arg4: memref<64x64xbf16, #tpu.memory_space<vmem>>, %arg5: memref<64x1xf32, #tpu.memory_space<vmem>>, %arg6: memref<64x64xbf16, #tpu.memory_space<vmem>>, %arg7: memref<64x1xf32, #tpu.memory_space<vmem>>, %arg8: memref<1x64xbf16, #tpu.memory_space<vmem>>, %arg9: memref<1x512xf32, #tpu.memory_space<vmem>>) attributes {dimension_semantics = [#tpu.dimension_semantics<parallel>], iteration_bounds = array<i64: 4>, scalar_prefetch = 0 : i64, scratch_operands = 0 : i64, tpu.core_type = #tpu.core_type<tc>, window_params = [{transform_indices = @transform_0, window_bounds = array<i64: 1, 512>}, {pipeline_mode = #tpu.pipeline_mode<synchronous>, transform_indices = @transform_1, window_bounds = array<i64: 64, 1>}, {pipeline_mode = #tpu.pipeline_mode<synchronous>, transform_indices = @transform_2, window_bounds = array<i64: 64, 1>}, {pipeline_mode = #tpu.pipeline_mode<synchronous>, transform_indices = @transform_3, window_bounds = array<i64: 64, 64>}, {pipeline_mode = #tpu.pipeline_mode<synchronous>, transform_indices = @transform_4, window_bounds = array<i64: 64, 1>}, {pipeline_mode = #tpu.pipeline_mode<synchronous>, transform_indices = @transform_5, window_bounds = array<i64: 64, 64>}, {pipeline_mode = #tpu.pipeline_mode<synchronous>, transform_indices = @transform_6, window_bounds = array<i64: 64, 1>}, {pipeline_mode = #tpu.pipeline_mode<synchronous>, transform_indices = @transform_7, window_bounds = array<i64: 1, 64>}, {transform_indices = @transform_8, window_bounds = array<i64: 1, 512>}]} {
    %c0 = arith.constant 0 : index
    %c0_0 = arith.constant 0 : index
    %0 = vector.load %arg1[%c0, %c0_0] : memref<1x512xf32, #tpu.memory_space<vmem>>, vector<1x512xf32>
    %c0_1 = arith.constant 0 : index
    %c0_2 = arith.constant 0 : index
    %1 = vector.load %arg2[%c0_1, %c0_2] : memref<64x1xf32, #tpu.memory_space<vmem>>, vector<64x1xf32>
    %2 = vector.broadcast %1 : vector<64x1xf32> to vector<64x512xf32>
    %3 = vector.broadcast %0 : vector<1x512xf32> to vector<64x512xf32>
    %4 = arith.mulf %2, %3 : vector<64x512xf32>
    %c0_3 = arith.constant 0 : index
    %c0_4 = arith.constant 0 : index
    %5 = vector.load %arg3[%c0_3, %c0_4] : memref<64x1xf32, #tpu.memory_space<vmem>>, vector<64x1xf32>
    %6 = vector.broadcast %5 : vector<64x1xf32> to vector<64x512xf32>
    %7 = arith.addf %4, %6 : vector<64x512xf32>
    %cst = arith.constant 0.000000e+00 : f32
    %8 = vector.broadcast %cst : f32 to vector<64x512xf32>
    %9 = arith.maximumf %7, %8 : vector<64x512xf32>
    %c0_5 = arith.constant 0 : index
    %c0_6 = arith.constant 0 : index
    %10 = vector.load %arg4[%c0_5, %c0_6] : memref<64x64xbf16, #tpu.memory_space<vmem>>, vector<64x64xbf16>
    %11 = arith.truncf %9 : vector<64x512xf32> to vector<64x512xbf16>
    %cst_7 = arith.constant dense<0.000000e+00> : vector<64x512xf32>
    %12 = tpu.matmul %10, %11, %cst_7 {dimension_numbers = #tpu.dot_dimension_numbers<[1], [0], [0], [1], [0, 0, 1, 1], [], []>} : vector<64x64xbf16>, vector<64x512xbf16>, vector<64x512xf32> -> vector<64x512xf32>
    %c0_8 = arith.constant 0 : index
    %c0_9 = arith.constant 0 : index
    %13 = vector.load %arg5[%c0_8, %c0_9] : memref<64x1xf32, #tpu.memory_space<vmem>>, vector<64x1xf32>
    %14 = vector.broadcast %13 : vector<64x1xf32> to vector<64x512xf32>
    %15 = arith.addf %12, %14 : vector<64x512xf32>
    %cst_10 = arith.constant 0.000000e+00 : f32
    %16 = vector.broadcast %cst_10 : f32 to vector<64x512xf32>
    %17 = arith.maximumf %15, %16 : vector<64x512xf32>
    %c0_11 = arith.constant 0 : index
    %c0_12 = arith.constant 0 : index
    %18 = vector.load %arg6[%c0_11, %c0_12] : memref<64x64xbf16, #tpu.memory_space<vmem>>, vector<64x64xbf16>
    %19 = arith.truncf %17 : vector<64x512xf32> to vector<64x512xbf16>
    %cst_13 = arith.constant dense<0.000000e+00> : vector<64x512xf32>
    %20 = tpu.matmul %18, %19, %cst_13 {dimension_numbers = #tpu.dot_dimension_numbers<[1], [0], [0], [1], [0, 0, 1, 1], [], []>} : vector<64x64xbf16>, vector<64x512xbf16>, vector<64x512xf32> -> vector<64x512xf32>
    %c0_14 = arith.constant 0 : index
    %c0_15 = arith.constant 0 : index
    %21 = vector.load %arg7[%c0_14, %c0_15] : memref<64x1xf32, #tpu.memory_space<vmem>>, vector<64x1xf32>
    %22 = vector.broadcast %21 : vector<64x1xf32> to vector<64x512xf32>
    %23 = arith.addf %20, %22 : vector<64x512xf32>
    %cst_16 = arith.constant 0.000000e+00 : f32
    %24 = vector.broadcast %cst_16 : f32 to vector<64x512xf32>
    %25 = arith.maximumf %23, %24 : vector<64x512xf32>
    %c0_17 = arith.constant 0 : index
    %c0_18 = arith.constant 0 : index
    %26 = vector.load %arg8[%c0_17, %c0_18] : memref<1x64xbf16, #tpu.memory_space<vmem>>, vector<1x64xbf16>
    %27 = arith.truncf %25 : vector<64x512xf32> to vector<64x512xbf16>
    %cst_19 = arith.constant dense<0.000000e+00> : vector<1x512xf32>
    %28 = tpu.matmul %26, %27, %cst_19 {dimension_numbers = #tpu.dot_dimension_numbers<[1], [0], [0], [1], [0, 0, 1, 1], [], []>} : vector<1x64xbf16>, vector<64x512xbf16>, vector<1x512xf32> -> vector<1x512xf32>
    %c0_20 = arith.constant 0 : index
    %c0_21 = arith.constant 0 : index
    %29 = vector.load %arg9[%c0_20, %c0_21] : memref<1x512xf32, #tpu.memory_space<vmem>>, vector<1x512xf32>
    tpu.vector_store %arg9[%c0_20, %c0_21], %28 {strides = array<i32>} : memref<1x512xf32, #tpu.memory_space<vmem>>, vector<1x512xf32>,
    return
  }
  func.func @transform_0(%arg0: i32) -> (i32, i32) {
    %c0_i32 = arith.constant 0 : i32
    %c0_i32_0 = arith.constant 0 : i32
    return %c0_i32, %arg0 : i32, i32
  }
  func.func @transform_1(%arg0: i32) -> (i32, i32) {
    %c0_i32 = arith.constant 0 : i32
    %c0_i32_0 = arith.constant 0 : i32
    %c0_i32_1 = arith.constant 0 : i32
    return %c0_i32, %c0_i32_0 : i32, i32
  }
  func.func @transform_2(%arg0: i32) -> (i32, i32) {
    %c0_i32 = arith.constant 0 : i32
    %c0_i32_0 = arith.constant 0 : i32
    %c0_i32_1 = arith.constant 0 : i32
    return %c0_i32, %c0_i32_0 : i32, i32
  }
  func.func @transform_3(%arg0: i32) -> (i32, i32) {
    %c0_i32 = arith.constant 0 : i32
    %c0_i32_0 = arith.constant 0 : i32
    %c0_i32_1 = arith.constant 0 : i32
    return %c0_i32, %c0_i32_0 : i32, i32
  }
  func.func @transform_4(%arg0: i32) -> (i32, i32) {
    %c0_i32 = arith.constant 0 : i32
    %c0_i32_0 = arith.constant 0 : i32
    %c0_i32_1 = arith.constant 0 : i32
    return %c0_i32, %c0_i32_0 : i32, i32
  }
  func.func @transform_5(%arg0: i32) -> (i32, i32) {
    %c0_i32 = arith.constant 0 : i32
    %c0_i32_0 = arith.constant 0 : i32
    %c0_i32_1 = arith.constant 0 : i32
    return %c0_i32, %c0_i32_0 : i32, i32
  }
  func.func @transform_6(%arg0: i32) -> (i32, i32) {
    %c0_i32 = arith.constant 0 : i32
    %c0_i32_0 = arith.constant 0 : i32
    %c0_i32_1 = arith.constant 0 : i32
    return %c0_i32, %c0_i32_0 : i32, i32
  }
  func.func @transform_7(%arg0: i32) -> (i32, i32) {
    %c0_i32 = arith.constant 0 : i32
    %c0_i32_0 = arith.constant 0 : i32
    %c0_i32_1 = arith.constant 0 : i32
    return %c0_i32, %c0_i32_0 : i32, i32
  }
  func.func @transform_8(%arg0: i32) -> (i32, i32) {
    %c0_i32 = arith.constant 0 : i32
    %c0_i32_0 = arith.constant 0 : i32
    return %c0_i32, %arg0 : i32, i32
  }
}

</mosaic_0001>

<bundles_post_ra>
// kernel: tpu_custom_call.1
= control target key start
LH: loop header
LB: loop body
LE: loop exit
PB: predicated region body
PF: predicated region fallthrough
CT: control target
= control target key end

     0   :  { %13 = vsyncpa [#allocation3], 0  ;;  %s1918_s0 = inlined_call_operand.vmem [shape: f32[1,2048], index: 0, kind: input, shape index: {}]   ;;  %s1919_s1 = inlined_call_operand.vmem [shape: f32[64,1], index: 1, kind: input, shape index: {}]   ;;  %s1920_s2 = inlined_call_operand.vmem [shape: f32[64,1], index: 2, kind: input, shape index: {}]   ;;  %s1921_s3 = inlined_call_operand.vmem [shape: bf16[64,64], index: 3, kind: input, shape index: {}]   ;;  %s1922_s4 = inlined_call_operand.vmem [shape: f32[64,1], index: 4, kind: input, shape index: {}]   ;;  %s1923_s5 = inlined_call_operand.vmem [shape: bf16[64,64], index: 5, kind: input, shape index: {}]   ;;  %s1924_s6 = inlined_call_operand.vmem [shape: f32[64,1], index: 6, kind: input, shape index: {}]   ;;  %s1925_s7 = inlined_call_operand.vmem [shape: bf16[1,64], index: 7, kind: input, shape index: {}]   ;;  %s1926_s8 = inlined_call_operand.hbm [shape: f32[1,2048], index: 8, kind: output, shape index: {}]  }
   0x1   :  { %15 = vsyncpa [#allocation3 + $0x1], 0  ;;  %s1490_s27 = smov 0   ;;  %s1492_s28 = smov 0  }
   0x2   :  { %s1494_s29 = smov 0   ;;  %s1496_s30 = smov 0  }
   0x3 LB: > { %s1511_s9 = sadd.s32 4294967295, %s1440_s30   ;;  %s1291_s10 = sadd.s32 4294967294, %s1440_s30   ;;  %s1440_s30 = sphi %s1496_s30, %s1932_s30   ;;  %s1436_s29 = sphi %s1494_s29, %s1931_s29   ;;  %s1432_s28 = sphi %s1492_s28, %s1930_s28   ;;  %s1428_s27 = sphi %s1490_s27, %s1929_s27  }
   0x4   : > { %s1515_s11 = sadd.s32 1, %s1440_s30   ;;  %s201_s12 = sadd.s32 1, %s1436_s29 }
   0x5   : > { %s198_s13 = ssub.s32 %s1440_s30, %s1515_s11  ;;  %p211_p0 = scmp.ne.s32.totalorder %s1436_s29, %s1432_s28 }
   0x6   : > { %p199_p1 = scmp.eq.s32.totalorder %s198_s13, 0  ;;  %p212_p2 = scmp.eq.s32.totalorder %s1511_s9, 3 }
   0x7   : > { %p217_p3 = scmp.ne.s32.totalorder %s1432_s28, %s1428_s27  ;;  %p218_p4 = scmp.eq.s32.totalorder %s1291_s10, 3 }
   0x8   : > { %s1526_s14 = scalar_select %p199_p1, %s1436_s29, %s201_s12  }
   0x9   : > { %p1528_p5 = por %p212_p2, %p211_p0  ;;  %p1532_p6 = por %p218_p4, %p217_p3 }
   0xa   : > { %p1294_p7 = scmp.ge.s32.totalorder %s1440_s30, 1  ;;  %p265_p8 = scmp.lt.s32.totalorder %s1440_s30, 5 }
   0xc   : > { %p266_p9 = pnand %p1294_p7, %p265_p8 }
   0xd   : > { %s1296_s13 = sshll.u32 (!%p266_p9), %s1511_s9, 2  ;;  %s295_s25 = sand.u32 (!%p266_p9), 1, %s1432_s28  }
   0xe   : > { %269 = sbr.rel (%p266_p9) target bundleno = 890 (0x37a), region = 52  ;;  %p299_p10 = scmp.lt.s32.totalorder (!%p266_p9), %s1296_s13, 15 }
   0xf   : > { %s1295_s26 = sshll.u32 (!%p266_p9), %s295_s25, 2  ;;  %s1328_s10 = sshll.u32 (!%p266_p9), %s1511_s9, 6 }
  0x10   : > { %s297_s12 = scalar_lea.vmem (!%p266_p9), [#allocation2], %s1295_s26  ;;  %s1221_s20 = scalar_lea.sflag (!%p266_p9), [#allocation3], %s295_s25 }
  0x11   : > { %s1444_s22 = smov (!%p266_p9), [#allocation2]  }
  0x12   : > { %s1384_s9 = sshll.u32 (!%p266_p9), %s1444_s22, 4  ;;  %s1385_s9 = int_to_ptr.vmem [resolvable:$false] %s1384_s9 }
  0x13   : > { %v413_v0 = vld [vmem:[%s1920_s2 + $0x30] sm:$0xff]  ;;  %v1442_v2 = vmov 0   ;;  %v414_v3 = vld [vmem:[%s1920_s2 + $0x38] sm:$0xff]  ;;  %v311_v5 = vld [vmem:[%s1919_s1 + $0x28] sm:$0xff]  ;;  %v355_v33 = vlaneseq  ;;  %s1934_s13 = smov (!%p299_p10, %s1296_s13), 15  ;;  %vm611_vm0 = vcmask 523264  }
  0x14   : > { %v312_v1 = vld [vmem:[%s1919_s1 + $0x30] sm:$0xff]  ;;  %1371 = vset.pattern.permute.xlu1 %v1442_v2  ;;  %1370 = vset.pattern.permute.xlu0 %v1442_v2  ;;  %v313_v4 = vld [vmem:[%s1919_s1 + $0x38] sm:$0xff]  ;;  %v310_v6 = vld [vmem:[%s1919_s1 + $0x20] sm:$0xff]  ;;  %s301_s19 = scalar_lea.vmem %s1918_s0, %s1934_s13  ;;  %s1235_s13 = sshll.u32 %s297_s12, 4  ;;  %s1236_s13 = int_to_ptr.vmem [resolvable:$true] %s1235_s13 }
  0x15   : > { %447 = vperm.xlu1 %1371, %v413_v0   ;;  %346 = vperm.xlu0 %1370, %v312_v1   ;;  %v412_v7 = vld [vmem:[%s1920_s2 + $0x28] sm:$0xff]  ;;  %v411_v8 = vld [vmem:[%s1920_s2 + $0x20] sm:$0xff]  ;;  %v309_v9 = vld [vmem:[%s1919_s1 + $0x18] sm:$0xff]  ;;  %v1640_v34 = vshrl.u32 %v355_v33, 7  ;;  %vm1217_vm1 = vcmp.lt.s32.totalorder %v355_v33, 512  ;;  %s1380_s21 = scalar_lea.vmem %s1236_s13, 64  ;;  %p1387_p0 = scmp.lt.s32.totalorder %s1236_s13, %s1385_s9 }
  0x16   : > { %656 = vmatprep.mubr.bf16.mxu0 %v1442_v2  ;;  %729 = vmatprep.mubr.bf16.mxu1 %v1442_v2  ;;  %v308_v10 = vld [vmem:[%s1919_s1 + $0x10] sm:$0xff]  ;;  %v410_v11 = vld [vmem:[%s1920_s2 + $0x18] sm:$0xff]  ;;  %v307_v13 = vld [vmem:[%s1919_s1 + $0x8] sm:$0xff]  ;;  %p1381_p11 = scmp.ne.s32.totalorder %s1236_s13, %s1380_s21  ;;  %s1386_s23 = scalar_lea.vmem %s1385_s9, 128 }
  0x17   : > { %v409_v12 = vld [vmem:[%s1920_s2 + $0x10] sm:$0xff]  ;;  %v306_v14 = vld [vmem:[%s1919_s1] sm:$0xff]  ;;  %v408_v15 = vld [vmem:[%s1920_s2 + $0x8] sm:$0xff]  ;;  %v357_v35 = vsub.s32 0, %v1640_v34  ;;  %v365_v36 = vsub.s32 2, %v1640_v34  ;;  %v361_v37 = vsub.s32 1, %v1640_v34  ;;  %p1388_p1 = scmp.lt.s32.totalorder %s1386_s23, %s1380_s21 }
  0x18   : > { %v407_v16 = vld [vmem:[%s1920_s2] sm:$0xff]  ;;  %v550_v17 = vld [vmem:[%s1922_s4 + $0x38] sm:$0xff]  ;;  %v549_v18 = vld [vmem:[%s1922_s4 + $0x30] sm:$0xff]  ;;  %v369_v38 = vsub.s32 3, %v1640_v34  ;;  %p1382_p12 = pnand %p1381_p11, %p1528_p5 }
  0x19   : > { %452 = vperm.xlu1 %1371, %v414_v3   ;;  %351 = vperm.xlu0 %1370, %v313_v4   ;;  %v548_v19 = vld [vmem:[%s1922_s4 + $0x28] sm:$0xff]  ;;  %v547_v20 = vld [vmem:[%s1922_s4 + $0x20] sm:$0xff]  ;;  %v546_v21 = vld [vmem:[%s1922_s4 + $0x18] sm:$0xff]  ;;  %p1389_p2 = por %p1388_p1, %p1387_p0 }
  0x1a   : > { %v545_v22 = vld [vmem:[%s1922_s4 + $0x10] sm:$0xff]  ;;  %v544_v23 = vld [vmem:[%s1922_s4 + $0x8] sm:$0xff]  ;;  %v543_v24 = vld [vmem:[%s1922_s4] sm:$0xff]  ;;  %p1383_p13 = pneg %p1382_p12 }
  0x1b   : > { %v833_v25 = vld [vmem:[%s1924_s6 + $0x38] sm:$0xff]  ;;  %v832_v26 = vld [vmem:[%s1924_s6 + $0x30] sm:$0xff]  ;;  %v831_v27 = vld [vmem:[%s1924_s6 + $0x28] sm:$0xff] }
  0x1c   : > { %v830_v28 = vld [vmem:[%s1924_s6 + $0x20] sm:$0xff]  ;;  %v829_v29 = vld [vmem:[%s1924_s6 + $0x18] sm:$0xff]  ;;  %v828_v30 = vld [vmem:[%s1924_s6 + $0x10] sm:$0xff]  ;;  %p1390_p3 = pnand %p1389_p2, %p1383_p13 }
  0x1d   : > { %341 = vperm.xlu1 %1371, %v311_v5   ;;  %336 = vperm.xlu0 %1370, %v310_v6   ;;  %v827_v31 = vld [vmem:[%s1924_s6 + $0x8] sm:$0xff]  ;;  %v826_v32 = vld [vmem:[%s1924_s6] sm:$0xff] }
  0x1e   : > { %v305_v39 = vld [vmem:[%s301_s19] sm:$0xf]  ;;  %s1233_s19 = scalar_lea.hbm %s1926_s8, %s1328_s10 }
  0x1f   : > { %v1649_v40 = vrot.slane %v305_v39, %v357_v35  ;;  %v1651_v41 = vrot.slane %v305_v39, %v365_v36  ;;  %v1653_v42 = vrot.slane %v305_v39, %v361_v37  ;;  %v1655_v43 = vrot.slane %v305_v39, %v369_v38 }
  0x21   : > { %442 = vperm.xlu1 %1371, %v412_v7   ;;  %437 = vperm.xlu0 %1370, %v411_v8  }
  0x25   : > { %331 = vperm.xlu1 %1371, %v309_v9   ;;  %326 = vperm.xlu0 %1370, %v308_v10  }
  0x29   : > { %432 = vperm.xlu1 %1371, %v410_v11   ;;  %427 = vperm.xlu0 %1370, %v409_v12  }
  0x2d   : > { %321 = vperm.xlu1 %1371, %v307_v13   ;;  %316 = vperm.xlu0 %1370, %v306_v14  }
  0x31   : > { %422 = vperm.xlu1 %1371, %v408_v15   ;;  %417 = vperm.xlu0 %1370, %v407_v16  }
  0x35   : > { %588 = vperm.xlu1 %1371, %v550_v17   ;;  %583 = vperm.xlu0 %1370, %v549_v18  }
  0x39   : > { %578 = vperm.xlu1 %1371, %v548_v19   ;;  %573 = vperm.xlu0 %1370, %v547_v20  }
  0x3d   : > { %568 = vperm.xlu1 %1371, %v546_v21   ;;  %563 = vperm.xlu0 %1370, %v545_v22  }
  0x41   : > { %558 = vperm.xlu1 %1371, %v544_v23   ;;  %553 = vperm.xlu0 %1370, %v543_v24  }
  0x45   : > { %871 = vperm.xlu1 %1371, %v833_v25   ;;  %866 = vperm.xlu0 %1370, %v832_v26  }
  0x49   : > { %861 = vperm.xlu1 %1371, %v831_v27   ;;  %856 = vperm.xlu0 %1370, %v830_v28  }
  0x4d   : > { %851 = vperm.xlu1 %1371, %v829_v29   ;;  %846 = vperm.xlu0 %1370, %v828_v30  }
  0x51   : > { %841 = vperm.xlu1 %1371, %v827_v31   ;;  %836 = vperm.xlu0 %1370, %v826_v32  }
  0x90   : > { %v448_v44 = vpop.permute.xlu1 %447  ;;  %v347_v45 = vpop.permute.xlu0 %346 }
  0x91   : > { %v399_v46 = vmul.f32 %v1649_v40, %v347_v45  ;;  %v401_v47 = vmul.f32 %v1651_v41, %v347_v45  ;;  %v400_v48 = vmul.f32 %v1653_v42, %v347_v45  ;;  %v402_v49 = vmul.f32 %v1655_v43, %v347_v45 }
  0x93   : > { %v480_v52 = vadd.f32 %v448_v44, %v400_v48  ;;  %v482_v53 = vadd.f32 %v448_v44, %v402_v49  ;;  %v479_v54 = vadd.f32 %v448_v44, %v399_v46  ;;  %v481_v58 = vadd.f32 %v448_v44, %v401_v47 }
  0x94   : > { %v453_v50 = vpop.permute.xlu1 %452  ;;  %v352_v51 = vpop.permute.xlu0 %351 }
  0x95   : > { %v403_v55 = vmul.f32 %v1649_v40, %v352_v51  ;;  %v405_v56 = vmul.f32 %v1651_v41, %v352_v51  ;;  %v404_v57 = vmul.f32 %v1653_v42, %v352_v51  ;;  %v406_v59 = vmul.f32 %v1655_v43, %v352_v51 }
  0x96   : > { %v512_v3 = vmax.f32 %v480_v52, 0.0  ;;  %v514_v4 = vmax.f32 %v482_v53, 0.0  ;;  %v511_v5 = vmax.f32 %v479_v54, 0.0  ;;  %v513_v6 = vmax.f32 %v481_v58, 0.0 }
  0x97   : > { %v484_v60 = vadd.f32 %v453_v50, %v404_v57  ;;  %v483_v61 = vadd.f32 %v453_v50, %v403_v55  ;;  %v485_v62 = vadd.f32 %v453_v50, %v405_v56  ;;  %v486_v1 = vadd.f32 %v453_v50, %v406_v59 }
  0x98   : > { %v342_v63 = vpop.permute.xlu1 %341  ;;  %v337_v0 = vpop.permute.xlu0 %336 }
  0x99   : > { %v395_v7 = vmul.f32 %v1649_v40, %v342_v63  ;;  %v396_v8 = vmul.f32 %v1653_v42, %v342_v63  ;;  %v397_v9 = vmul.f32 %v1651_v41, %v342_v63  ;;  %v398_v10 = vmul.f32 %v1655_v43, %v342_v63 }
  0x9a   : > { %v516_v11 = vmax.f32 %v484_v60, 0.0  ;;  %v518_v12 = vmax.f32 %v486_v1, 0.0  ;;  %v515_v13 = vmax.f32 %v483_v61, 0.0  ;;  %v517_v14 = vmax.f32 %v485_v62, 0.0 }
  0x9b   : > { %v391_v15 = vmul.f32 %v1649_v40, %v337_v0  ;;  %v392_v16 = vmul.f32 %v1653_v42, %v337_v0  ;;  %v393_v17 = vmul.f32 %v1651_v41, %v337_v0  ;;  %v394_v18 = vmul.f32 %v1655_v43, %v337_v0 }
  0x9c   : > { %v443_v19 = vpop.permute.xlu1 %442  ;;  %v438_v20 = vpop.permute.xlu0 %437  ;;  %v540_v29 = vpack.c.bf16 %v516_v11, %v512_v3  ;;  %v542_v30 = vpack.c.bf16 %v518_v12, %v514_v4  ;;  %v539_v31 = vpack.c.bf16 %v515_v13, %v511_v5  ;;  %v541_v32 = vpack.c.bf16 %v517_v14, %v513_v6 }
  0x9d   : > { %v475_v21 = vadd.f32 %v443_v19, %v395_v7  ;;  %v476_v22 = vadd.f32 %v443_v19, %v396_v8  ;;  %v477_v23 = vadd.f32 %v443_v19, %v397_v9  ;;  %v478_v24 = vadd.f32 %v443_v19, %v398_v10 }
  0x9e   : > { %v471_v25 = vadd.f32 %v438_v20, %v391_v15  ;;  %v472_v26 = vadd.f32 %v438_v20, %v392_v16  ;;  %v473_v27 = vadd.f32 %v438_v20, %v393_v17  ;;  %v474_v28 = vadd.f32 %v438_v20, %v394_v18  ;;  %632 = vmatprep.subr.bf16.mxu0 %v540_v29 }
  0x9f   : > { %v508_v38 = vmax.f32 %v476_v22, 0.0  ;;  %v510_v44 = vmax.f32 %v478_v24, 0.0  ;;  %705 = vmatprep.subr.bf16.mxu1 %v542_v30  ;;  %633 = vmatpush1.bf16.msra.mxu0 %v539_v31  ;;  %v507_v51 = vmax.f32 %v475_v21, 0.0  ;;  %v509_v61 = vmax.f32 %v477_v23, 0.0 }
  0xa0   : > { %v332_v35 = vpop.permute.xlu1 %331  ;;  %v327_v36 = vpop.permute.xlu0 %326  ;;  %v504_v37 = vmax.f32 %v472_v26, 0.0  ;;  %v506_v39 = vmax.f32 %v474_v28, 0.0  ;;  %v503_v47 = vmax.f32 %v471_v25, 0.0  ;;  %706 = vmatpush1.bf16.msra.mxu1 %v541_v32  ;;  %v505_v60 = vmax.f32 %v473_v27, 0.0 }
  0xa1   : > { %v387_v45 = vmul.f32 %v1649_v40, %v332_v35  ;;  %v388_v46 = vmul.f32 %v1653_v42, %v332_v35  ;;  %v389_v48 = vmul.f32 %v1651_v41, %v332_v35  ;;  %v390_v49 = vmul.f32 %v1655_v43, %v332_v35 }
  0xa2   : > { %v383_v50 = vmul.f32 %v1649_v40, %v327_v36  ;;  %v384_v52 = vmul.f32 %v1653_v42, %v327_v36  ;;  %v385_v53 = vmul.f32 %v1651_v41, %v327_v36  ;;  %v536_v54 = vpack.c.bf16 %v508_v38, %v504_v37 }
  0xa3   : > { %v538_v55 = vpack.c.bf16 %v510_v44, %v506_v39  ;;  %v386_v56 = vmul.f32 %v1655_v43, %v327_v36  ;;  %v535_v59 = vpack.c.bf16 %v507_v51, %v503_v47  ;;  %v537_v7 = vpack.c.bf16 %v509_v61, %v505_v60 }
  0xa4   : > { %v433_v57 = vpop.permute.xlu1 %432  ;;  %v428_v58 = vpop.permute.xlu0 %427  ;;  %634 = vmatprep.subr.bf16.mxu0 %v536_v54  ;;  %v1372_v54 = vld [vmem:[%s1921_s3] sm:$0xff]  }
  0xa5   : > { %707 = vmatprep.subr.bf16.mxu1 %v538_v55  ;;  %v467_v62 = vadd.f32 %v433_v57, %v387_v45  ;;  %v468_v63 = vadd.f32 %v433_v57, %v388_v46  ;;  %v469_v0 = vadd.f32 %v433_v57, %v389_v48  ;;  %v470_v1 = vadd.f32 %v433_v57, %v390_v49  ;;  %v1373_v55 = vld [vmem:[%s1921_s3 + $0x8] sm:$0xff]   ;;  %v1375_v57 = vld [vmem:[%s1921_s3 + $0x18] sm:$0xff]  }
  0xa6   : > { %v463_v3 = vadd.f32 %v428_v58, %v383_v50  ;;  %v464_v4 = vadd.f32 %v428_v58, %v384_v52  ;;  %v465_v5 = vadd.f32 %v428_v58, %v385_v53  ;;  %635 = vmatpush1.bf16.msra.mxu0 %v535_v59  ;;  %v466_v6 = vadd.f32 %v428_v58, %v386_v56  ;;  %v1374_v56 = vld [vmem:[%s1921_s3 + $0x10] sm:$0xff]  }
  0xa7   : > { %v500_v8 = vmax.f32 %v468_v63, 0.0  ;;  %v499_v9 = vmax.f32 %v467_v62, 0.0  ;;  %708 = vmatpush1.bf16.msra.mxu1 %v537_v7  ;;  %v502_v14 = vmax.f32 %v470_v1, 0.0  ;;  %v501_v23 = vmax.f32 %v469_v0, 0.0 }
  0xa8   : > { %v322_v10 = vpop.permute.xlu1 %321  ;;  %v317_v11 = vpop.permute.xlu0 %316  ;;  %v496_v12 = vmax.f32 %v464_v4, 0.0  ;;  %v495_v13 = vmax.f32 %v463_v3, 0.0  ;;  %v497_v15 = vmax.f32 %v465_v5, 0.0  ;;  %v498_v21 = vmax.f32 %v466_v6, 0.0 }
  0xa9   : > { %v379_v16 = vmul.f32 %v1649_v40, %v322_v10  ;;  %v380_v17 = vmul.f32 %v1653_v42, %v322_v10  ;;  %v381_v18 = vmul.f32 %v1651_v41, %v322_v10  ;;  %v382_v19 = vmul.f32 %v1655_v43, %v322_v10 }
  0xaa   : > { %v532_v20 = vpack.c.bf16 %v500_v8, %v496_v12  ;;  %v531_v22 = vpack.c.bf16 %v499_v9, %v495_v13  ;;  %v375_v24 = vmul.f32 %v1649_v40, %v317_v11  ;;  %v376_v25 = vmul.f32 %v1653_v42, %v317_v11 }
  0xab   : > { %v377_v26 = vmul.f32 %v1651_v41, %v317_v11  ;;  %v378_v27 = vmul.f32 %v1655_v43, %v317_v11  ;;  %v534_v30 = vpack.c.bf16 %v502_v14, %v498_v21  ;;  %v533_v44 = vpack.c.bf16 %v501_v23, %v497_v15 }
  0xac   : > { %v423_v28 = vpop.permute.xlu1 %422  ;;  %v418_v29 = vpop.permute.xlu0 %417  ;;  %636 = vmatprep.subr.bf16.mxu0 %v532_v20 }
  0xad   : > { %v459_v31 = vadd.f32 %v423_v28, %v379_v16  ;;  %v460_v32 = vadd.f32 %v423_v28, %v380_v17  ;;  %v461_v35 = vadd.f32 %v423_v28, %v381_v18  ;;  %v462_v36 = vadd.f32 %v423_v28, %v382_v19  ;;  %637 = vmatpush1.bf16.msra.mxu0 %v531_v22 }
  0xae   : > { %v455_v37 = vadd.f32 %v418_v29, %v375_v24  ;;  %v456_v38 = vadd.f32 %v418_v29, %v376_v25  ;;  %v457_v39 = vadd.f32 %v418_v29, %v377_v26  ;;  %709 = vmatprep.subr.bf16.mxu1 %v534_v30  ;;  %v458_v40 = vadd.f32 %v418_v29, %v378_v27 }
  0xaf   : > { %v492_v42 = vmax.f32 %v460_v32, 0.0  ;;  %v491_v45 = vmax.f32 %v459_v31, 0.0  ;;  %v494_v46 = vmax.f32 %v462_v36, 0.0  ;;  %710 = vmatpush1.bf16.msra.mxu1 %v533_v44  ;;  %v493_v49 = vmax.f32 %v461_v35, 0.0 }
  0xb0   : > { %v488_v41 = vmax.f32 %v456_v38, 0.0  ;;  %v487_v43 = vmax.f32 %v455_v37, 0.0  ;;  %v489_v47 = vmax.f32 %v457_v39, 0.0  ;;  %v490_v48 = vmax.f32 %v458_v40, 0.0  ;;  %v584_v1 = vpop.permute.xlu0 %583  ;;  %v589_v4 = vpop.permute.xlu1 %588 }
  0xb2   : > { %v528_v50 = vpack.c.bf16 %v492_v42, %v488_v41  ;;  %v527_v51 = vpack.c.bf16 %v491_v45, %v487_v43  ;;  %v530_v52 = vpack.c.bf16 %v494_v46, %v490_v48  ;;  %v529_v53 = vpack.c.bf16 %v493_v49, %v489_v47 }
  0xb4   : > { %638 = vmatprep.subr.bf16.mxu0 %v528_v50  ;;  %711 = vmatprep.subr.bf16.mxu1 %v530_v52  ;;  %v574_v10 = vpop.permute.xlu0 %573  ;;  %v579_v12 = vpop.permute.xlu1 %578 }
  0xb5   : > { %639 = vmatpush1.bf16.msra.mxu0 %v527_v51  ;;  %712 = vmatpush1.bf16.msra.mxu1 %v529_v53 }
  0xb8   : > { %1301 = vmatmul.mubr.msk.bf16.vlgmr.msra.gmra.mxu0 %vm611_vm0, %v1372_v54  ;;  %1305 = vmatmul.mubr.msk.bf16.vlgmr.msra.gmra.mxu1 %vm611_vm0, %v1372_v54  ;;  %v1729_v18 = vpop.permute.xlu0 %563  ;;  %v569_v20 = vpop.permute.xlu1 %568 }
  0xb9   : > { %666 = vmatprep.mubr.bf16.mxu0 %v1442_v2  ;;  %739 = vmatprep.mubr.bf16.mxu1 %v1442_v2 }
  0xbc   : > { %v1731_v26 = vpop.permute.xlu0 %553  ;;  %v1733_v28 = vpop.permute.xlu1 %558 }
  0xc0   : > { %1302 = vmatmul.mubr.msk.bf16.gmra.mxu0 %vm611_vm0, %v1373_v55  ;;  %1306 = vmatmul.mubr.msk.bf16.gmra.mxu1 %vm611_vm0, %v1373_v55 }
  0xc1   : > { %676 = vmatprep.mubr.bf16.mxu0 %v1442_v2  ;;  %749 = vmatprep.mubr.bf16.mxu1 %v1442_v2 }
  0xc8   : > { %1303 = vmatmul.mubr.msk.bf16.gmra.mxu0 %vm611_vm0, %v1374_v56  ;;  %1307 = vmatmul.mubr.msk.bf16.gmra.mxu1 %vm611_vm0, %v1374_v56 }
  0xc9   : > { %686 = vmatprep.mubr.bf16.mxu0 %v1442_v2  ;;  %759 = vmatprep.mubr.bf16.mxu1 %v1442_v2 }
  0xd0   : > { %1304 = vmatmul.mubr.msk.bf16.gmra.mxu0 %vm611_vm0, %v1375_v57  ;;  %1308 = vmatmul.mubr.msk.bf16.gmra.mxu1 %vm611_vm0, %v1375_v57 }
  0xd1   : > { %938 = vmatprep.mubr.bf16.mxu0 %v1442_v2  ;;  %1011 = vmatprep.mubr.bf16.mxu1 %v1442_v2 }
 0x178   : > { %v1717_v58 = vpop.f32.mrf.mxu0  ;;  %v1719_v59 = vpop.f32.mrf.mxu1 }
 0x17a   : > { %v660_v60 = vpop.f32.mrf.mxu0  ;;  %v733_v61 = vpop.f32.mrf.mxu1 }
 0x17b   : > { %v1736_v29 = vadd.f32 %v660_v60, %v1731_v26  ;;  %v1739_v30 = vadd.f32 %v733_v61, %v1731_v26 }
 0x17c   : > { %v1721_v62 = vpop.f32.mrf.mxu0  ;;  %v1723_v63 = vpop.f32.mrf.mxu1 }
 0x17e   : > { %v664_v0 = vpop.f32.mrf.mxu0  ;;  %v737_v3 = vpop.f32.mrf.mxu1 }
 0x17f   : > { %v1742_v32 = vadd.f32 %v664_v0, %v1733_v28  ;;  %v1745_v35 = vadd.f32 %v737_v3, %v1733_v28 }
 0x180   : > { %v1725_v5 = vpop.f32.mrf.mxu0  ;;  %v1727_v6 = vpop.f32.mrf.mxu1 }
 0x182   : > { %v670_v7 = vpop.f32.mrf.mxu0  ;;  %v743_v8 = vpop.f32.mrf.mxu1 }
 0x183   : > { %v1748_v36 = vadd.f32 %v670_v7, %v1729_v18  ;;  %v1751_v37 = vadd.f32 %v743_v8, %v1729_v18 }
 0x184   : > { %v672_v9 = vpop.f32.mrf.mxu0  ;;  %v745_v11 = vpop.f32.mrf.mxu1 }
 0x185   : > { %v1753_v39 = vadd.f32 %v672_v9, %v569_v20  ;;  %v1755_v40 = vadd.f32 %v745_v11, %v569_v20 }
 0x186   : > { %v674_v13 = vpop.f32.mrf.mxu0  ;;  %v747_v14 = vpop.f32.mrf.mxu1 }
 0x187   : > { %v1757_v44 = vadd.f32 %v674_v13, %v569_v20  ;;  %v1759_v42 = vadd.f32 %v747_v14, %v569_v20 }
 0x188   : > { %v678_v15 = vpop.f32.mrf.mxu0  ;;  %v751_v16 = vpop.f32.mrf.mxu1 }
 0x189   : > { %v679_v41 = vadd.f32 %v678_v15, %v574_v10 }
 0x18a   : > { %v680_v17 = vpop.f32.mrf.mxu0  ;;  %v753_v19 = vpop.f32.mrf.mxu1 }
 0x18b   : > { %v681_v54 = vadd.f32 %v680_v17, %v574_v10  ;;  %v754_v55 = vadd.f32 %v753_v19, %v574_v10 }
 0x18c   : > { %v682_v21 = vpop.f32.mrf.mxu0  ;;  %v755_v22 = vpop.f32.mrf.mxu1 }
 0x18d   : > { %v683_v61 = vadd.f32 %v682_v21, %v579_v12  ;;  %v756_v0 = vadd.f32 %v755_v22, %v579_v12  ;;  %v789_v19 = vmax.f32 %v754_v55, 0.0 }
 0x18e   : > { %v684_v23 = vpop.f32.mrf.mxu0  ;;  %v757_v24 = vpop.f32.mrf.mxu1 }
 0x18f   : > { %v685_v46 = vadd.f32 %v684_v23, %v579_v12  ;;  %v758_v49 = vadd.f32 %v757_v24, %v579_v12  ;;  %v752_v24 = vadd.f32 %v751_v16, %v574_v10  ;;  %v783_v12 = vmax.f32 %v1757_v44, 0.0 }
 0x190   : > { %v688_v25 = vpop.f32.mrf.mxu0  ;;  %v761_v27 = vpop.f32.mrf.mxu1  ;;  %v792_v21 = vmax.f32 %v756_v0, 0.0  ;;  %v663_v16 = vadd.f32 %v1721_v62, %v1733_v28  ;;  %v779_v44 = vmax.f32 %v1748_v36, 0.0  ;;  %v784_v62 = vmax.f32 %v1755_v40, 0.0 }
 0x191   : > { %v689_v50 = vadd.f32 %v688_v25, %v584_v1  ;;  %v762_v56 = vadd.f32 %v761_v27, %v584_v1  ;;  %v791_v8 = vmax.f32 %v685_v46, 0.0  ;;  %v793_v14 = vmax.f32 %v758_v49, 0.0 }
 0x192   : > { %v690_v31 = vpop.f32.mrf.mxu0  ;;  %v763_v38 = vpop.f32.mrf.mxu1  ;;  %v787_v25 = vmax.f32 %v681_v54, 0.0  ;;  %v785_v46 = vmax.f32 %v1759_v42, 0.0  ;;  %v781_v42 = vmax.f32 %v1751_v37, 0.0  ;;  %v777_v36 = vmax.f32 %v1745_v35, 0.0 }
 0x193   : > { %v691_v43 = vadd.f32 %v690_v31, %v584_v1  ;;  %v764_v51 = vadd.f32 %v763_v38, %v584_v1  ;;  %v794_v15 = vmax.f32 %v689_v50, 0.0  ;;  %v796_v31 = vmax.f32 %v762_v56, 0.0 }
 0x194   : > { %v692_v45 = vpop.f32.mrf.mxu0  ;;  %v765_v48 = vpop.f32.mrf.mxu1  ;;  %v790_v1 = vmax.f32 %v683_v61, 0.0  ;;  %v821_v10 = vpack.c.bf16 %v793_v14, %v789_v19  ;;  %v775_v50 = vmax.f32 %v1742_v32, 0.0  ;;  %v773_v32 = vmax.f32 %v1739_v30, 0.0  ;;  %v1377_v30 = vld [vmem:[%s1923_s5 + $0x8] sm:$0xff]   ;;  %v1379_v61 = vld [vmem:[%s1923_s5 + $0x18] sm:$0xff]  }
 0x195   : > { %v693_v47 = vadd.f32 %v692_v45, %v589_v4  ;;  %v766_v52 = vadd.f32 %v765_v48, %v589_v4  ;;  %v795_v9 = vmax.f32 %v691_v43, 0.0  ;;  %v797_v20 = vmax.f32 %v764_v51, 0.0  ;;  %v867_v14 = vpop.permute.xlu0 %866 }
 0x196   : > { %v694_v53 = vpop.f32.mrf.mxu0  ;;  %v767_v60 = vpop.f32.mrf.mxu1  ;;  %v669_v45 = vadd.f32 %v1725_v5, %v1729_v18  ;;  %v786_v43 = vmax.f32 %v679_v41, 0.0  ;;  %v788_v48 = vmax.f32 %v752_v24, 0.0  ;;  %v736_v5 = vadd.f32 %v1723_v63, %v1733_v28 }
 0x197   : > { %v695_v57 = vadd.f32 %v694_v53, %v589_v4  ;;  %v798_v3 = vmax.f32 %v693_v47, 0.0  ;;  %v768_v7 = vadd.f32 %v767_v60, %v589_v4  ;;  %v800_v11 = vmax.f32 %v766_v52, 0.0  ;;  %v1378_v60 = vld [vmem:[%s1923_s5 + $0x10] sm:$0xff]  }
 0x198   : > { %v819_v4 = vpack.c.bf16 %v791_v8, %v787_v25  ;;  %v742_v47 = vadd.f32 %v1727_v6, %v1729_v18  ;;  %v782_v41 = vmax.f32 %v1753_v39, 0.0  ;;  %v818_v49 = vpack.c.bf16 %v790_v1, %v786_v43 }
 0x199   : > { %v799_v13 = vmax.f32 %v695_v57, 0.0  ;;  %v801_v23 = vmax.f32 %v768_v7, 0.0  ;;  %v822_v27 = vpack.c.bf16 %v798_v3, %v794_v15  ;;  %v824_v22 = vpack.c.bf16 %v800_v11, %v796_v31 }
 0x19a   : > { %v815_v51 = vpack.c.bf16 %v783_v12, %v779_v44  ;;  %v820_v6 = vpack.c.bf16 %v792_v21, %v788_v48  ;;  %v659_v18 = vadd.f32 %v1717_v58, %v1731_v26  ;;  %v778_v52 = vmax.f32 %v669_v45, 0.0 }
 0x19b   : > { %v823_v17 = vpack.c.bf16 %v799_v13, %v795_v9  ;;  %v825_v38 = vpack.c.bf16 %v801_v23, %v797_v20  ;;  %v817_v53 = vpack.c.bf16 %v785_v46, %v781_v42  ;;  %v732_v63 = vadd.f32 %v1719_v59, %v1731_v26  ;;  %v872_v20 = vpop.permute.xlu1 %871 }
 0x19c   : > { %v771_v28 = vmax.f32 %v1736_v29, 0.0  ;;  %v780_v37 = vmax.f32 %v742_v47, 0.0  ;;  %v774_v39 = vmax.f32 %v663_v16, 0.0  ;;  %v814_v40 = vpack.c.bf16 %v782_v41, %v778_v52  ;;  %v1376_v29 = vld [vmem:[%s1923_s5] sm:$0xff]  }
 0x19d   : > { %914 = vmatprep.subr.bf16.mxu0 %v823_v17  ;;  %987 = vmatprep.subr.bf16.mxu1 %v825_v38  ;;  %v776_v54 = vmax.f32 %v736_v5, 0.0  ;;  %v770_v35 = vmax.f32 %v659_v18, 0.0  ;;  %v813_v56 = vpack.c.bf16 %v777_v36, %v773_v32  ;;  %v772_v57 = vmax.f32 %v732_v63, 0.0  ;;  %v857_v17 = vpop.permute.xlu0 %856 }
 0x19e   : > { %915 = vmatpush1.bf16.msra.mxu0 %v822_v27  ;;  %988 = vmatpush1.bf16.msra.mxu1 %v824_v22  ;;  %v811_v58 = vpack.c.bf16 %v775_v50, %v771_v28  ;;  %v816_v55 = vpack.c.bf16 %v784_v62, %v780_v37 }
 0x19f   : > { %916 = vmatprep.subr.bf16.mxu0 %v819_v4  ;;  %989 = vmatprep.subr.bf16.mxu1 %v821_v10  ;;  %v810_v59 = vpack.c.bf16 %v774_v39, %v770_v35  ;;  %v812_v26 = vpack.c.bf16 %v776_v54, %v772_v57  ;;  %v862_v1 = vpop.permute.xlu1 %861 }
 0x1a1   : > { %v1823_v22 = vpop.permute.xlu0 %846 }
 0x1a2   : > { %917 = vmatpush1.bf16.msra.mxu0 %v818_v49  ;;  %990 = vmatpush1.bf16.msra.mxu1 %v820_v6 }
 0x1a3   : > { %918 = vmatprep.subr.bf16.mxu0 %v815_v51  ;;  %991 = vmatprep.subr.bf16.mxu1 %v817_v53  ;;  %v852_v46 = vpop.permute.xlu1 %851 }
 0x1a5   : > { %v1825_v48 = vpop.permute.xlu0 %836 }
 0x1a6   : > { %919 = vmatpush1.bf16.msra.mxu0 %v814_v40  ;;  %992 = vmatpush1.bf16.msra.mxu1 %v816_v55 }
 0x1a7   : > { %920 = vmatprep.subr.bf16.mxu0 %v811_v58  ;;  %993 = vmatprep.subr.bf16.mxu1 %v813_v56  ;;  %v1827_v42 = vpop.permute.xlu1 %841 }
 0x1aa   : > { %921 = vmatpush1.bf16.msra.mxu0 %v810_v59  ;;  %994 = vmatpush1.bf16.msra.mxu1 %v812_v26 }
 0x1ad   : > { %1313 = vmatmul.mubr.msk.bf16.vlgmr.msra.gmra.mxu0 %vm611_vm0, %v1376_v29  ;;  %1317 = vmatmul.mubr.msk.bf16.vlgmr.msra.gmra.mxu1 %vm611_vm0, %v1376_v29 }
 0x1ae   : > { %948 = vmatprep.mubr.bf16.mxu0 %v1442_v2  ;;  %1021 = vmatprep.mubr.bf16.mxu1 %v1442_v2 }
 0x1b5   : > { %1314 = vmatmul.mubr.msk.bf16.gmra.mxu0 %vm611_vm0, %v1377_v30  ;;  %1318 = vmatmul.mubr.msk.bf16.gmra.mxu1 %vm611_vm0, %v1377_v30 }
 0x1b6   : > { %958 = vmatprep.mubr.bf16.mxu0 %v1442_v2  ;;  %1031 = vmatprep.mubr.bf16.mxu1 %v1442_v2 }
 0x1bd   : > { %1315 = vmatmul.mubr.msk.bf16.gmra.mxu0 %vm611_vm0, %v1378_v60  ;;  %1319 = vmatmul.mubr.msk.bf16.gmra.mxu1 %vm611_vm0, %v1378_v60 }
 0x1be   : > { %968 = vmatprep.mubr.bf16.mxu0 %v1442_v2  ;;  %1041 = vmatprep.mubr.bf16.mxu1 %v1442_v2 }
 0x1c5   : > { %1316 = vmatmul.mubr.msk.bf16.gmra.mxu0 %vm611_vm0, %v1379_v61  ;;  %1320 = vmatmul.mubr.msk.bf16.gmra.mxu1 %vm611_vm0, %v1379_v61 }
 0x1c6   : > { %1136 = vmatprep.mubr.bf16.mxu0 %v1442_v2  ;;  %1177 = vmatprep.mubr.bf16.mxu1 %v1442_v2 }
 0x26d   : > { %v1811_v0 = vpop.f32.mrf.mxu0  ;;  %v1813_v3 = vpop.f32.mrf.mxu1 }
 0x26f   : > { %v942_v7 = vpop.f32.mrf.mxu0  ;;  %v1015_v8 = vpop.f32.mrf.mxu1 }
 0x270   : > { %v1830_v41 = vadd.f32 %v942_v7, %v1825_v48  ;;  %v1833_v49 = vadd.f32 %v1015_v8, %v1825_v48 }
 0x271   : > { %v1815_v9 = vpop.f32.mrf.mxu0  ;;  %v1817_v11 = vpop.f32.mrf.mxu1 }
 0x273   : > { %v946_v13 = vpop.f32.mrf.mxu0  ;;  %v1019_v15 = vpop.f32.mrf.mxu1 }
 0x274   : > { %v1836_v62 = vadd.f32 %v946_v13, %v1827_v42  ;;  %v1839_v51 = vadd.f32 %v1019_v15, %v1827_v42 }
 0x275   : > { %v1819_v23 = vpop.f32.mrf.mxu0  ;;  %v1821_v24 = vpop.f32.mrf.mxu1 }
 0x277   : > { %v952_v25 = vpop.f32.mrf.mxu0  ;;  %v1025_v2 = vpop.f32.mrf.mxu1 }
 0x278   : > { %v1842_v6 = vadd.f32 %v952_v25, %v1823_v22  ;;  %v1845_v18 = vadd.f32 %v1025_v2, %v1823_v22 }
 0x279   : > { %v954_v31 = vpop.f32.mrf.mxu0  ;;  %v1027_v19 = vpop.f32.mrf.mxu1 }
 0x27a   : > { %v1847_v52 = vadd.f32 %v954_v31, %v852_v46  ;;  %v1849_v53 = vadd.f32 %v1027_v19, %v852_v46 }
 0x27b   : > { %v956_v27 = vpop.f32.mrf.mxu0  ;;  %v1029_v38 = vpop.f32.mrf.mxu1 }
 0x27c   : > { %v1851_v63 = vadd.f32 %v956_v27, %v852_v46  ;;  %v1853_v28 = vadd.f32 %v1029_v38, %v852_v46 }
 0x27d   : > { %v960_v12 = vpop.f32.mrf.mxu0  ;;  %v1033_v21 = vpop.f32.mrf.mxu1 }
 0x27e   : > { %v961_v32 = vadd.f32 %v960_v12, %v857_v17 }
 0x27f   : > { %v962_v4 = vpop.f32.mrf.mxu0  ;;  %v1035_v45 = vpop.f32.mrf.mxu1 }
 0x280   : > { %v963_v26 = vadd.f32 %v962_v4, %v857_v17  ;;  %v1036_v29 = vadd.f32 %v1035_v45, %v857_v17 }
 0x281   : > { %v964_v43 = vpop.f32.mrf.mxu0  ;;  %v1037_v10 = vpop.f32.mrf.mxu1 }
 0x282   : > { %v965_v7 = vadd.f32 %v964_v43, %v862_v1  ;;  %v1038_v8 = vadd.f32 %v1037_v10, %v862_v1  ;;  %v1071_v45 = vmax.f32 %v1036_v29, 0.0 }
 0x283   : > { %v966_v16 = vpop.f32.mrf.mxu0  ;;  %v1039_v47 = vpop.f32.mrf.mxu1 }
 0x284   : > { %v967_v39 = vadd.f32 %v966_v16, %v862_v1  ;;  %v1040_v55 = vadd.f32 %v1039_v47, %v862_v1  ;;  %v1034_v16 = vadd.f32 %v1033_v21, %v857_v17  ;;  %v1069_v47 = vmax.f32 %v963_v26, 0.0 }
 0x285   : > { %v970_v44 = vpop.f32.mrf.mxu0  ;;  %v1043_v5 = vpop.f32.mrf.mxu1  ;;  %v1065_v1 = vmax.f32 %v1851_v63, 0.0  ;;  %v1074_v43 = vmax.f32 %v1038_v8, 0.0  ;;  %v945_v21 = vadd.f32 %v1815_v9, %v1827_v42  ;;  %v1061_v63 = vmax.f32 %v1842_v6, 0.0 }
 0x286   : > { %v971_v35 = vadd.f32 %v970_v44, %v867_v14  ;;  %v1044_v30 = vadd.f32 %v1043_v5, %v867_v14  ;;  %v1073_v25 = vmax.f32 %v967_v39, 0.0  ;;  %v1075_v27 = vmax.f32 %v1040_v55, 0.0 }
 0x287   : > { %v972_v50 = vpop.f32.mrf.mxu0  ;;  %v1045_v36 = vpop.f32.mrf.mxu1  ;;  %v1068_v39 = vmax.f32 %v961_v32, 0.0  ;;  %v1064_v32 = vmax.f32 %v1847_v52, 0.0  ;;  %v1057_v55 = vmax.f32 %v1836_v62, 0.0  ;;  %v1066_v9 = vmax.f32 %v1849_v53, 0.0 }
 0x288   : > { %v973_v40 = vadd.f32 %v972_v50, %v867_v14  ;;  %v1046_v56 = vadd.f32 %v1045_v36, %v867_v14  ;;  %v1076_v38 = vmax.f32 %v971_v35, 0.0  ;;  %v1078_v44 = vmax.f32 %v1044_v30, 0.0 }
 0x289   : > { %v974_v37 = vpop.f32.mrf.mxu0  ;;  %v1047_v58 = vpop.f32.mrf.mxu1  ;;  %v1072_v14 = vmax.f32 %v965_v7, 0.0  ;;  %v951_v36 = vadd.f32 %v1819_v23, %v1823_v22  ;;  %v1096_v17 = vpack.c.bf16 %v1075_v27, %v1071_v45  ;;  %v1018_v23 = vadd.f32 %v1817_v11, %v1827_v42 }
 0x28a   : > { %v975_v54 = vadd.f32 %v974_v37, %v872_v20  ;;  %v1048_v57 = vadd.f32 %v1047_v58, %v872_v20  ;;  %v1077_v2 = vmax.f32 %v973_v40, 0.0  ;;  %v1079_v12 = vmax.f32 %v1046_v56, 0.0 }
 0x28b   : > { %v976_v59 = vpop.f32.mrf.mxu0  ;;  %v1049_v61 = vpop.f32.mrf.mxu1  ;;  %v1067_v37 = vmax.f32 %v1853_v28, 0.0  ;;  %v1024_v40 = vadd.f32 %v1821_v24, %v1823_v22  ;;  %v1063_v28 = vmax.f32 %v1845_v18, 0.0  ;;  %v1093_v58 = vpack.c.bf16 %v1072_v14, %v1068_v39 }
 0x28c   : > { %v977_v60 = vadd.f32 %v976_v59, %v872_v20  ;;  %v1080_v13 = vmax.f32 %v975_v54, 0.0  ;;  %v1050_v15 = vadd.f32 %v1049_v61, %v872_v20  ;;  %v1082_v31 = vmax.f32 %v1048_v57, 0.0 }
 0x28d   : > { %v1094_v20 = vpack.c.bf16 %v1073_v25, %v1069_v47  ;;  %v1070_v54 = vmax.f32 %v1034_v16, 0.0  ;;  %v1090_v35 = vpack.c.bf16 %v1065_v1, %v1061_v63  ;;  %v941_v22 = vadd.f32 %v1811_v0, %v1825_v48 }
 0x28e   : > { %v1081_v19 = vmax.f32 %v977_v60, 0.0  ;;  %v1083_v46 = vmax.f32 %v1050_v15, 0.0  ;;  %v1097_v5 = vpack.c.bf16 %v1080_v13, %v1076_v38  ;;  %v1099_v10 = vpack.c.bf16 %v1082_v31, %v1078_v44 }
 0x28f   : > { %v1095_v24 = vpack.c.bf16 %v1074_v43, %v1070_v54  ;;  %v1059_v6 = vmax.f32 %v1839_v51, 0.0  ;;  %v1060_v56 = vmax.f32 %v951_v36, 0.0  ;;  %v1092_v57 = vpack.c.bf16 %v1067_v37, %v1063_v28 }
 0x290   : > { %v1098_v4 = vpack.c.bf16 %v1081_v19, %v1077_v2  ;;  %v1100_v50 = vpack.c.bf16 %v1083_v46, %v1079_v12  ;;  %v1014_v11 = vadd.f32 %v1813_v3, %v1825_v48  ;;  %v1053_v42 = vmax.f32 %v1830_v41, 0.0  ;;  %v1084_v41 = vld [vmem:[%s1925_s7] sm:$0x1] }
 0x291   : > { %v1062_v18 = vmax.f32 %v1024_v40, 0.0  ;;  %v1055_v62 = vmax.f32 %v1833_v49, 0.0  ;;  %v1056_v52 = vmax.f32 %v945_v21, 0.0  ;;  %v1089_v53 = vpack.c.bf16 %v1064_v32, %v1060_v56 }
 0x292   : > { %1112 = vmatprep.subr.bf16.mxu0 %v1098_v4  ;;  %1153 = vmatprep.subr.bf16.mxu1 %v1100_v50  ;;  %v1058_v59 = vmax.f32 %v1018_v23, 0.0  ;;  %v1086_v0 = vpack.c.bf16 %v1057_v55, %v1053_v42  ;;  %v1052_v51 = vmax.f32 %v941_v22, 0.0  ;;  %v1054_v30 = vmax.f32 %v1014_v11, 0.0 }
 0x293   : > { %1113 = vmatpush1.bf16.msra.mxu0 %v1097_v5  ;;  %1154 = vmatpush1.bf16.msra.mxu1 %v1099_v10  ;;  %v1091_v26 = vpack.c.bf16 %v1066_v9, %v1062_v18  ;;  %v1088_v29 = vpack.c.bf16 %v1059_v6, %v1055_v62  ;;  %v1443_v49 = vmov 1966171168  }
 0x294   : > { %1114 = vmatprep.subr.bf16.mxu0 %v1094_v20  ;;  %1155 = vmatprep.subr.bf16.mxu1 %v1096_v17  ;;  %v1085_v3 = vpack.c.bf16 %v1056_v52, %v1052_v51  ;;  %v1087_v48 = vpack.c.bf16 %v1058_v59, %v1054_v30  ;;  %v1193_v60 = vunpack.c.l.s4 %v1443_v49 }
 0x296   : > { %v1194_v61 = vunpack.c.0.s8 %v1193_v60 }
 0x297   : > { %1115 = vmatpush1.bf16.msra.mxu0 %v1093_v58  ;;  %1156 = vmatpush1.bf16.msra.mxu1 %v1095_v24 }
 0x298   : > { %1116 = vmatprep.subr.bf16.mxu0 %v1090_v35  ;;  %1157 = vmatprep.subr.bf16.mxu1 %v1092_v57  ;;  %v1197_v13 = vsub.s32 %v1194_v61, %v1640_v34 }
 0x29b   : > { %1117 = vmatpush1.bf16.msra.mxu0 %v1089_v53  ;;  %1158 = vmatpush1.bf16.msra.mxu1 %v1091_v26 }
 0x29c   : > { %1118 = vmatprep.subr.bf16.mxu0 %v1086_v0  ;;  %1159 = vmatprep.subr.bf16.mxu1 %v1088_v29 }
 0x29f   : > { %1119 = vmatpush1.bf16.msra.mxu0 %v1085_v3  ;;  %1160 = vmatpush1.bf16.msra.mxu1 %v1087_v48 }
 0x2a2   : > { %1321 = vmatmul.mubr.msk.bf16.vlgmr.msra.gmra.mxu0 %vm611_vm0, %v1084_v41  ;;  %1322 = vmatmul.mubr.msk.bf16.vlgmr.msra.gmra.mxu1 %vm611_vm0, %v1084_v41 }
 0x362   : > { %v1138_v7 = vpop.f32.mrf.mxu0  ;;  %v1179_v8 = vpop.f32.mrf.mxu1 }
 0x364   : > { %v1140_v15 = vpop.f32.mrf.mxu0  ;;  %v1181_v2 = vpop.f32.mrf.mxu1 }
 0x365   : > { %v1190_v25 = vcombine.low %v1138_v7, %v1140_v15  ;;  %v1191_v31 = vcombine.low %v1179_v8, %v1181_v2 }
 0x366   : > { %v1142_v19 = vpop.f32.mrf.mxu0  ;;  %v1183_v38 = vpop.f32.mrf.mxu1 }
 0x367   : > { %v1198_v27 = vrot.slane %v1190_v25, %v1197_v13  ;;  %v1205_v12 = vrot.slane %v1191_v31, %v1197_v13 }
 0x368   : > { %v1143_v46 = vpop.f32.mrf.mxu0  ;;  %v1184_v16 = vpop.f32.mrf.mxu1 }
 0x369   : > { %v1206_v47 = vcombine.low %v1198_v27, %v1205_v12 }
 0x36b   : > { %v1213_v44 = vrot.slane %v1206_v47, %v1197_v13 }
 0x36d   : > { %1219 = vst.msk [vmem:[%s297_s12] sm:$0xf] %vm1217_vm1, %v1213_v44 }
 0x36e   : > { %1393 = shalt.err (!%p1390_p3)
}
 0x36f   : > { %s1394_s24 = scalar_lea.hbm %s1233_s19, 64  ;;  %s1398_s10 = scalar_lea.hbm %s1926_s8, 256 }
 0x370   : > { %p1395_p4 = scmp.ne.s32.totalorder %s1233_s19, %s1394_s24  ;;  %p1399_p9 = scmp.lt.s32.totalorder %s1233_s19, %s1926_s8 }
 0x371   : > { %p1400_p10 = scmp.lt.s32.totalorder %s1398_s10, %s1394_s24 }
 0x372   : > { %p1396_p7 = pnand %p1395_p4, %p1528_p5 }
 0x373   : > { %p1401_p11 = por %p1400_p10, %p1399_p9 }
 0x374   : > { %p1397_p8 = pneg %p1396_p7 }
 0x376   : > { %p1402_p12 = pnand %p1401_p11, %p1397_p8 }
 0x378   : > { %1405 = shalt.err (!%p1402_p12)
}
 0x379   : > { %1329 = dma.vmem_to_hbm [thread:$0]  (%p1528_p5), %s1236_s13, 64, %s1233_s19, %s1221_s20  }
 0x37a PF: > { %p1335_p13 = scmp.ge.s32.totalorder %s1440_s30, 2  ;;  %s1247_s18 = sand.u32 1, %s1428_s27  }
 0x37b   : > { %s1248_s21 = scalar_lea.sflag [#allocation3], %s1247_s18 }
 0x37c   : > { %p1332_p0 = pnand %p1335_p13, %p1532_p6 }
 0x37e   : > { %p1333_p1 = pneg %p1332_p0 }
 0x380   : > { %1423 = dma.done.wait (%p1333_p1), %s1248_s21, 64  }
 0x381   : > { %1425 = vsyncadd (%p1333_p1), %s1248_s21, 4294967232  ;;  %p18_p2 = scmp.ge.s32.totalorder %s1515_s11, 6   ;;  %s1929_s27 = smov %s1432_s28 }
 0x382   : > { %s1930_s28 = smov %s1436_s29  ;;  %s1931_s29 = smov %s1526_s14 }
 0x383   : > { %s1932_s30 = smov %s1515_s11  ;;  %20 = sbr.rel (!%p18_p2) target bundleno = 3 (0x3), region = 87 }
 0x388   :  { %1253 = vsyncpa [#allocation3], 1 }
 0x389   :  { %1255 = vsyncpa [#allocation3 + $0x1], 1 }

</bundles_post_ra>
